<compile_context>
chip_gen: v7x
topology: tpu7x:2x2x1
jax: 0.10.0
libtpu: 0.0.40
codegen_flags: <defaults>
</compile_context>

<pallas_src>
import numpy as np
import jax
import jax.numpy as jnp
from jax.experimental import pallas as pl
from jax.experimental.pallas import tpu as pltpu


# ----------------------------------------------------------------------------
# Kernel: fused exp + diag_embed + mask-add + batched mat-vec, flat layout.
# ----------------------------------------------------------------------------
def _reparam_kernel(mu_ref, ls_ref, lmask_ref, eps_ref,
                    dmask_ref, etile_ref, rsum_ref,
                    z_ref, ldiag_ref):
    exp_ls = jnp.exp(ls_ref[...])            # (TB, L)   — EUP work
    eps = eps_ref[...]                       # (TB, L)
    lmask = lmask_ref[...]                   # (TB, L*L) flat lane-dense tile

    # Row-broadcast along the flat (i*L + j) dim via tiny 0/1 MXU matmuls:
    #   tiled[b, i*L + j] = src[b, j]
    etile = etile_ref[...]
    eps_tiled = jnp.dot(eps, etile, preferred_element_type=jnp.float32)
    exp_tiled = jnp.dot(exp_ls, etile, preferred_element_type=jnp.float32)

    # L_diag = L_mask + diag_embed(exp(log_sigma)); diagonal picked on the VPU.
    ldiag_ref[...] = lmask + exp_tiled * dmask_ref[...]

    # z = mu + L_diag @ eps, split so the z matmul never consumes the stored
    # L_diag tile: diagonal term elementwise, L_mask term as a per-row
    # reduction over the flat dim driven through the MXU by rsum.
    lower = jnp.dot(lmask * eps_tiled, rsum_ref[...],
                    preferred_element_type=jnp.float32)
    z_ref[...] = mu_ref[...] + exp_ls * eps + lower


# ----------------------------------------------------------------------------
# Trace-time 0/1 helper matrices (depend only on static L).
# ----------------------------------------------------------------------------
def _reparam_constants(L):
    k = np.arange(L)
    c = np.arange(L * L)
    # dmask[0, c] = 1 on flat diagonal positions c == i*(L+1).
    dmask = ((c[None, :] % (L + 1)) == 0).astype(np.float32)        # (1, L*L)
    # etile[j, c] = 1 where c % L == j  -> row-broadcast of a length-L vector.
    etile = ((c[None, :] % L) == k[:, None]).astype(np.float32)     # (L, L*L)
    # rsum[c, i] = 1 where c // L == i  -> per-row reduction (the bmm sum).
    rsum = ((c[:, None] // L) == k[None, :]).astype(np.float32)     # (L*L, L)
    return jnp.asarray(dmask), jnp.asarray(etile), jnp.asarray(rsum)


def _pick_block_b(B, LL):
    """Batch tile so one (TB, L*L) f32 block is ~2 MiB (fits the smallest
    default scoped VMEM with double-buffered in+out streams)."""
    target = max(8, (2 * 1024 * 1024) // max(LL * 4, 1))
    if B <= target:
        return B
    if B % 8 != 0:
        return B                      # cannot honour the (8, .) sublane rule
    tb = min((target // 8) * 8, B)
    while tb > 8 and B % tb != 0:
        tb -= 8
    return tb if B % tb == 0 else B


# ----------------------------------------------------------------------------
# Wrapper: matches ReparametrizationTrickFull.forward(mu, log_sigma, L_mask).
# ----------------------------------------------------------------------------
def reparametrization_trick_full(mu, log_sigma, L_mask, eps, *, block_b=None):
    """Returns (z, L_diag).  `eps` corresponds to torch.randn_like(mu)."""
    B, L = mu.shape
    LL = L * L
    lmask_flat = L_mask.reshape(B, LL)        # wrapper-side layout plumbing
    dmask, etile, rsum = _reparam_constants(L)

    if block_b is None:
        block_b = _pick_block_b(B, LL)
    block_b = min(block_b, B)
    if B % block_b != 0 or (block_b != B and block_b % 8 != 0):
        raise ValueError(f"block_b={block_b} incompatible with B={B}")
    nb = B // block_b

    def batched(last):
        return pl.BlockSpec((block_b, last), lambda b: (b, 0))

    def resident(shape):
        return pl.BlockSpec(shape, lambda b: (0, 0))

    z, ldiag_flat = pl.pallas_call(
        _reparam_kernel,
        out_shape=(jax.ShapeDtypeStruct((B, L), jnp.float32),
                   jax.ShapeDtypeStruct((B, LL), jnp.float32)),
        grid=(nb,),
        in_specs=[batched(L),          # mu
                  batched(L),          # log_sigma
                  batched(LL),         # L_mask (flat)
                  batched(L),          # eps
                  resident((1, LL)),   # diag mask      (VMEM-resident)
                  resident((L, LL)),   # etile          (VMEM-resident)
                  resident((LL, L))],  # rsum           (VMEM-resident)
        out_specs=(batched(L), batched(LL)),
        compiler_params=pltpu.CompilerParams(
            dimension_semantics=("parallel",)),
    )(mu, log_sigma, lmask_flat, eps, dmask, etile, rsum)
    return z, ldiag_flat.reshape(B, L, L)


if __name__ == "__main__":
    B, L = 16, 8      # small shapes; block_b=8 exercises a 2-step batch grid

    root = jax.random.PRNGKey(0)
    k_mu, k_ls, k_mask, k_eps = jax.random.split(root, 4)

    mu = jax.random.normal(k_mu, (B, L), jnp.float32)
    log_sigma = 0.1 * jax.random.normal(k_ls, (B, L), jnp.float32)
    # L_mask as produced upstream: strictly-lower-triangular (B, L, L).
    L_mask = jnp.tril(jax.random.normal(k_mask, (B, L, L), jnp.float32), k=-1)
    eps = jax.random.normal(k_eps, (B, L), jnp.float32)   # torch.randn_like(mu)

    z, L_diag = reparametrization_trick_full(mu, log_sigma, L_mask, eps,
                                             block_b=8)
    jax.block_until_ready((z, L_diag))

    # Pure-JAX reference check of the fused kernel.
    L_diag_ref = L_mask + jnp.exp(log_sigma)[:, :, None] * jnp.eye(L, dtype=jnp.float32)
    z_ref = mu + jnp.einsum("bij,bj->bi", L_diag_ref, eps)

    assert z.shape == (B, L)
    assert L_diag.shape == (B, L, L)
    assert jnp.allclose(L_diag, L_diag_ref, atol=1e-5, rtol=1e-5)
    assert jnp.allclose(z, z_ref, atol=1e-4, rtol=1e-4)
    print("KERNEL_OK")
</pallas_src>

<mosaic_0001>
module attributes {stable_mosaic.version = 11 : i64} {
  func.func @_reparam_kernel(%arg0: i32, %arg1: memref<8x8xf32, #tpu.memory_space<vmem>>, %arg2: memref<8x8xf32, #tpu.memory_space<vmem>>, %arg3: memref<8x64xf32, #tpu.memory_space<vmem>>, %arg4: memref<8x8xf32, #tpu.memory_space<vmem>>, %arg5: memref<1x64xf32, #tpu.memory_space<vmem>>, %arg6: memref<8x64xf32, #tpu.memory_space<vmem>>, %arg7: memref<64x8xf32, #tpu.memory_space<vmem>>, %arg8: memref<8x8xf32, #tpu.memory_space<vmem>>, %arg9: memref<8x64xf32, #tpu.memory_space<vmem>>) attributes {dimension_semantics = [#tpu.dimension_semantics<parallel>], iteration_bounds = array<i64: 2>, scalar_prefetch = 0 : i64, scratch_operands = 0 : i64, tpu.core_type = #tpu.core_type<tc>, window_params = [{transform_indices = @transform_0, window_bounds = array<i64: 8, 8>}, {transform_indices = @transform_1, window_bounds = array<i64: 8, 8>}, {transform_indices = @transform_2, window_bounds = array<i64: 8, 64>}, {transform_indices = @transform_3, window_bounds = array<i64: 8, 8>}, {pipeline_mode = #tpu.pipeline_mode<synchronous>, transform_indices = @transform_4, window_bounds = array<i64: 1, 64>}, {pipeline_mode = #tpu.pipeline_mode<synchronous>, transform_indices = @transform_5, window_bounds = array<i64: 8, 64>}, {pipeline_mode = #tpu.pipeline_mode<synchronous>, transform_indices = @transform_6, window_bounds = array<i64: 64, 8>}, {transform_indices = @transform_7, window_bounds = array<i64: 8, 8>}, {transform_indices = @transform_8, window_bounds = array<i64: 8, 64>}]} {
    %c0 = arith.constant 0 : index
    %c0_0 = arith.constant 0 : index
    %0 = vector.load %arg2[%c0, %c0_0] : memref<8x8xf32, #tpu.memory_space<vmem>>, vector<8x8xf32>
    %1 = math.exp %0 : vector<8x8xf32>
    %c0_1 = arith.constant 0 : index
    %c0_2 = arith.constant 0 : index
    %2 = vector.load %arg4[%c0_1, %c0_2] : memref<8x8xf32, #tpu.memory_space<vmem>>, vector<8x8xf32>
    %c0_3 = arith.constant 0 : index
    %c0_4 = arith.constant 0 : index
    %3 = vector.load %arg3[%c0_3, %c0_4] : memref<8x64xf32, #tpu.memory_space<vmem>>, vector<8x64xf32>
    %c0_5 = arith.constant 0 : index
    %c0_6 = arith.constant 0 : index
    %4 = vector.load %arg6[%c0_5, %c0_6] : memref<8x64xf32, #tpu.memory_space<vmem>>, vector<8x64xf32>
    %cst = arith.constant dense<0.000000e+00> : vector<8x64xf32>
    %5 = tpu.matmul %2, %4, %cst {dimension_numbers = #tpu.dot_dimension_numbers<[1], [0], [0], [1], [0, 0, 1, 1], [], []>} : vector<8x8xf32>, vector<8x64xf32>, vector<8x64xf32> -> vector<8x64xf32>
    %cst_7 = arith.constant dense<0.000000e+00> : vector<8x64xf32>
    %6 = tpu.matmul %1, %4, %cst_7 {dimension_numbers = #tpu.dot_dimension_numbers<[1], [0], [0], [1], [0, 0, 1, 1], [], []>} : vector<8x8xf32>, vector<8x64xf32>, vector<8x64xf32> -> vector<8x64xf32>
    %c0_8 = arith.constant 0 : index
    %c0_9 = arith.constant 0 : index
    %7 = vector.load %arg5[%c0_8, %c0_9] : memref<1x64xf32, #tpu.memory_space<vmem>>, vector<1x64xf32>
    %8 = vector.broadcast %7 : vector<1x64xf32> to vector<8x64xf32>
    %9 = arith.mulf %6, %8 : vector<8x64xf32>
    %10 = arith.addf %3, %9 : vector<8x64xf32>
    %c0_10 = arith.constant 0 : index
    %c0_11 = arith.constant 0 : index
    %11 = vector.load %arg9[%c0_10, %c0_11] : memref<8x64xf32, #tpu.memory_space<vmem>>, vector<8x64xf32>
    tpu.vector_store %arg9[%c0_10, %c0_11], %10 {strides = array<i32>} : memref<8x64xf32, #tpu.memory_space<vmem>>, vector<8x64xf32>,
    %12 = arith.mulf %3, %5 : vector<8x64xf32>
    %c0_12 = arith.constant 0 : index
    %c0_13 = arith.constant 0 : index
    %13 = vector.load %arg7[%c0_12, %c0_13] : memref<64x8xf32, #tpu.memory_space<vmem>>, vector<64x8xf32>
    %cst_14 = arith.constant dense<0.000000e+00> : vector<8x8xf32>
    %14 = tpu.matmul %12, %13, %cst_14 {dimension_numbers = #tpu.dot_dimension_numbers<[1], [0], [0], [1], [0, 0, 1, 1], [], []>} : vector<8x64xf32>, vector<64x8xf32>, vector<8x8xf32> -> vector<8x8xf32>
    %c0_15 = arith.constant 0 : index
    %c0_16 = arith.constant 0 : index
    %15 = vector.load %arg1[%c0_15, %c0_16] : memref<8x8xf32, #tpu.memory_space<vmem>>, vector<8x8xf32>
    %16 = arith.mulf %1, %2 : vector<8x8xf32>
    %17 = arith.addf %15, %16 : vector<8x8xf32>
    %18 = arith.addf %17, %14 : vector<8x8xf32>
    %c0_17 = arith.constant 0 : index
    %c0_18 = arith.constant 0 : index
    %19 = vector.load %arg8[%c0_17, %c0_18] : memref<8x8xf32, #tpu.memory_space<vmem>>, vector<8x8xf32>
    tpu.vector_store %arg8[%c0_17, %c0_18], %18 {strides = array<i32>} : memref<8x8xf32, #tpu.memory_space<vmem>>, vector<8x8xf32>,
    return
  }
  func.func @transform_0(%arg0: i32) -> (i32, i32) {
    %c0_i32 = arith.constant 0 : i32
    %c0_i32_0 = arith.constant 0 : i32
    return %arg0, %c0_i32 : i32, i32
  }
  func.func @transform_1(%arg0: i32) -> (i32, i32) {
    %c0_i32 = arith.constant 0 : i32
    %c0_i32_0 = arith.constant 0 : i32
    return %arg0, %c0_i32 : i32, i32
  }
  func.func @transform_2(%arg0: i32) -> (i32, i32) {
    %c0_i32 = arith.constant 0 : i32
    %c0_i32_0 = arith.constant 0 : i32
    return %arg0, %c0_i32 : i32, i32
  }
  func.func @transform_3(%arg0: i32) -> (i32, i32) {
    %c0_i32 = arith.constant 0 : i32
    %c0_i32_0 = arith.constant 0 : i32
    return %arg0, %c0_i32 : i32, i32
  }
  func.func @transform_4(%arg0: i32) -> (i32, i32) {
    %c0_i32 = arith.constant 0 : i32
    %c0_i32_0 = arith.constant 0 : i32
    %c0_i32_1 = arith.constant 0 : i32
    return %c0_i32, %c0_i32_0 : i32, i32
  }
  func.func @transform_5(%arg0: i32) -> (i32, i32) {
    %c0_i32 = arith.constant 0 : i32
    %c0_i32_0 = arith.constant 0 : i32
    %c0_i32_1 = arith.constant 0 : i32
    return %c0_i32, %c0_i32_0 : i32, i32
  }
  func.func @transform_6(%arg0: i32) -> (i32, i32) {
    %c0_i32 = arith.constant 0 : i32
    %c0_i32_0 = arith.constant 0 : i32
    %c0_i32_1 = arith.constant 0 : i32
    return %c0_i32, %c0_i32_0 : i32, i32
  }
  func.func @transform_7(%arg0: i32) -> (i32, i32) {
    %c0_i32 = arith.constant 0 : i32
    %c0_i32_0 = arith.constant 0 : i32
    return %arg0, %c0_i32 : i32, i32
  }
  func.func @transform_8(%arg0: i32) -> (i32, i32) {
    %c0_i32 = arith.constant 0 : i32
    %c0_i32_0 = arith.constant 0 : i32
    return %arg0, %c0_i32 : i32, i32
  }
}

</mosaic_0001>

<bundles_post_ra>
// kernel: tpu_custom_call.1
= control target key start
LH: loop header
LB: loop body
LE: loop exit
PB: predicated region body
PF: predicated region fallthrough
CT: control target
= control target key end

     0   :  { %s1136_s0 = inlined_call_operand.vmem [shape: f32[16,8], index: 0, kind: input, shape index: {}]   ;;  %s1137_s1 = inlined_call_operand.vmem [shape: f32[16,8], index: 1, kind: input, shape index: {}]   ;;  %s1138_s2 = inlined_call_operand.vmem [shape: f32[16,64], index: 2, kind: input, shape index: {}]   ;;  %s1139_s3 = inlined_call_operand.vmem [shape: f32[16,8], index: 3, kind: input, shape index: {}]   ;;  %s1140_s4 = inlined_call_operand.vmem [shape: f32[1,64], index: 4, kind: input, shape index: {}]   ;;  %s1141_s5 = inlined_call_operand.vmem [shape: f32[8,64], index: 5, kind: input, shape index: {}]   ;;  %s1142_s6 = inlined_call_operand.vmem [shape: f32[64,8], index: 6, kind: input, shape index: {}]   ;;  %s1143_s7 = inlined_call_operand.vmem [shape: f32[16,8], index: 7, kind: output, shape index: {0}]   ;;  %s1144_s8 = inlined_call_operand.hbm [shape: f32[16,64], index: 8, kind: output, shape index: {1}]  }
   0x1   :  { %1145 = sst [smem:[#allocation5_spill]] %s1137_s1 }
   0x2   :  { %14 = vsyncpa [#allocation3], 0 }
   0x3   :  { %16 = vsyncpa [#allocation3 + $0x1], 0  ;;  %s983_s27 = smov 0   ;;  %s985_s28 = smov 0  }
   0x4   :  { %s987_s29 = smov 0   ;;  %s989_s30 = smov 0  }
   0x5 LB: > { %s1004_s9 = sadd.s32 4294967295, %s932_s30   ;;  %s754_s10 = sadd.s32 4294967294, %s932_s30   ;;  %s932_s30 = sphi %s989_s30, %s1152_s30   ;;  %s928_s29 = sphi %s987_s29, %s1151_s29   ;;  %s924_s28 = sphi %s985_s28, %s1150_s28   ;;  %s920_s27 = sphi %s983_s27, %s1149_s27  }
   0x6   : > { %s1008_s11 = sadd.s32 1, %s932_s30   ;;  %s222_s12 = sadd.s32 1, %s928_s29 }
   0x7   : > { %s219_s13 = ssub.s32 %s932_s30, %s1008_s11  ;;  %p232_p0 = scmp.ne.s32.totalorder %s928_s29, %s924_s28 }
   0x8   : > { %p220_p1 = scmp.eq.s32.totalorder %s219_s13, 0  ;;  %p233_p2 = scmp.eq.s32.totalorder %s1004_s9, 1 }
   0x9   : > { %p238_p3 = scmp.ne.s32.totalorder %s924_s28, %s920_s27  ;;  %p239_p4 = scmp.eq.s32.totalorder %s754_s10, 1 }
   0xa   : > { %s1019_s14 = scalar_select %p220_p1, %s928_s29, %s222_s12  }
   0xb   : > { %p1021_p5 = por %p233_p2, %p232_p0  ;;  %p1025_p6 = por %p239_p4, %p238_p3 }
   0xc   : > { %p757_p7 = scmp.ge.s32.totalorder %s932_s30, 1  ;;  %p294_p8 = scmp.lt.s32.totalorder %s932_s30, 3 }
   0xe   : > { %p295_p9 = pnand %p757_p7, %p294_p8 }
   0xf   : > { %v368_v0 = vld [vmem:[%s1141_s5] sm:$0xff] (!%p295_p9)  ;;  %p343_p10 = scmp.lt.s32.totalorder (!%p295_p9), %s1004_s9, 1  ;;  %v934_v1 = vmov (!%p295_p9), 0.0   ;;  %vm935_vm0 = vmmov (!%p295_p9), 0   ;;  %v529_v3 = vld [vmem:[%s1142_s6 + $0x8] sm:$0xff] (!%p295_p9)  ;;  %v530_v4 = vld [vmem:[%s1142_s6 + $0x10] sm:$0xff] (!%p295_p9) }
  0x10   : > { %298 = sbr.rel (%p295_p9) target bundleno = 458 (0x1ca), region = 48  ;;  %785 = vmatprep.subr.mxu1 (!%p295_p9), %v934_v1  ;;  %787 = vmatprep.mubr.msk.f32.mxu1 (!%p295_p9), %vm935_vm0, %v934_v1  ;;  %v528_v2 = vld [vmem:[%s1142_s6] sm:$0xff] (!%p295_p9)  ;;  %v936_v5 = vmov (!%p295_p9), 0.0|0.0   ;;  %v531_v7 = vld [vmem:[%s1142_s6 + $0x18] sm:$0xff] (!%p295_p9)  ;;  %vm369_vm1 = vcmask (!%p295_p9), 64512   ;;  %s1148_s1 = sld [smem:[#allocation5_spill]] (!%p295_p9) }
  0x11   : > { %786 = vmatpush3.msra.mxu1 (!%p295_p9), %v368_v0  ;;  %814 = vmatprep.subr.bf16.mxu0 (!%p295_p9), %v936_v5  ;;  %v815_v6 = vpack.c.bf16 (!%p295_p9), %v529_v3, %v528_v2  ;;  %v818_v8 = vpack.c.bf16 (!%p295_p9), %v531_v7, %v530_v4  ;;  %v532_v9 = vld [vmem:[%s1142_s6 + $0x20] sm:$0xff] (!%p295_p9)  ;;  %v533_v10 = vld [vmem:[%s1142_s6 + $0x28] sm:$0xff] (!%p295_p9)  ;;  %v534_v16 = vld [vmem:[%s1142_s6 + $0x30] sm:$0xff] (!%p295_p9)  ;;  %vm525_vm2 = vcmask (!%p295_p9), 523264   ;;  %s340_s23 = sand.u32 (!%p295_p9), 1, %s924_s28   ;;  %s769_s26 = sshll.u32 (!%p295_p9), %s1004_s9, 7 }
  0x12   : > { %790 = vmatprep.subr.mxu1 (!%p295_p9), %v934_v1  ;;  %811 = vmatprep.mubr.msk.f32.mxu0 (!%p295_p9), %vm935_vm0, %v934_v1  ;;  %v821_v14 = vpack.c.bf16 (!%p295_p9), %v533_v10, %v532_v9  ;;  %v535_v17 = vld [vmem:[%s1142_s6 + $0x38] sm:$0xff] (!%p295_p9)  ;;  %v766_v23 = vld [vmem:[%s1140_s4] ss:$0 sm:$0xff] (!%p295_p9)  ;;  %s758_s24 = sshll.u32 (!%p295_p9), %s340_s23, 3  ;;  %s619_s19 = scalar_lea.sflag (!%p295_p9), [#allocation3], %s340_s23 }
  0x13   : > { %816 = vmatpush3.bf16.msra.mxu0 (!%p295_p9), %v815_v6  ;;  %v824_v18 = vpack.c.bf16 (!%p295_p9), %v535_v17, %v534_v16 }
  0x14   : > { %817 = vmatprep.subr.bf16.mxu0 (!%p295_p9), %v936_v5 }
  0x17   : > { %s344_s25 = scalar_select %p343_p10, %s1004_s9, 1  ;;  %819 = vmatpush3.bf16.msra.mxu0 %v818_v8 }
  0x18   : > { %820 = vmatprep.subr.bf16.mxu0 %v936_v5 }
  0x19   : > { %s1050_s12 = sshll.u32 %s344_s25, 3  ;;  %s342_s25 = scalar_lea.vmem [#allocation2], %s758_s24 }
  0x1a   : > { %s350_s18 = scalar_lea.vmem %s1148_s1, %s1050_s12  ;;  %s358_s21 = scalar_lea.vmem %s1139_s3, %s1050_s12 }
  0x1b   : > { %v363_v11 = vld [vmem:[%s350_s18] sm:$0xff]  ;;  %822 = vmatpush3.bf16.msra.mxu0 %v821_v14  ;;  %s354_s20 = scalar_lea.vmem %s1138_s2, %s1050_s12  ;;  %s635_s10 = sshll.u32 %s342_s25, 4  ;;  %s636_s10 = int_to_ptr.vmem [resolvable:$true] %s635_s10 }
  0x1c   : > { %v1066_v12 = vld [vmem:[%s358_s21] sm:$0xff]  ;;  %v364_v13 = vmul.f32 1.442695, %v363_v11  ;;  %823 = vmatprep.subr.bf16.mxu0 %v936_v5  ;;  %s1090_s18 = scalar_lea.hbm %s1144_s8, %s769_s26  ;;  %s937_s21 = smov [#allocation2]  }
  0x1d   : > { %788 = vmatmul.mubr.msk.f32.vlgmr.msra.gmra.mrb[0].mxu1 %vm369_vm1, %v1066_v12  ;;  %v367_v19 = vld [vmem:[%s354_s20] sm:$0xff]  ;;  %s870_s20 = scalar_lea.vmem %s636_s10, 128  ;;  %s874_s22 = sshll.u32 %s937_s21, 4  ;;  %s875_s22 = int_to_ptr.vmem [resolvable:$false] %s874_s22 }
  0x1e   : > { %791 = vmatpush3.msra.mxu1 %v368_v0  ;;  %868 = vpow2.f32 %v364_v13  ;;  %792 = vmatprep.mubr.msk.f32.mxu1 %vm935_vm0, %v934_v1  ;;  %p871_p11 = scmp.ne.s32.totalorder %s636_s10, %s870_s20  ;;  %s876_s1 = scalar_lea.vmem %s875_s22, 256 }
  0x1f   : > { %825 = vmatpush3.bf16.msra.mxu0 %v824_v18  ;;  %p877_p0 = scmp.lt.s32.totalorder %s636_s10, %s875_s22  ;;  %p878_p1 = scmp.lt.s32.totalorder %s876_s1, %s870_s20 }
  0x20   : > { %p872_p12 = pnand %p871_p11, %p1021_p5 }
  0x21   : > { %p879_p2 = por %p878_p1, %p877_p0 }
  0x22   : > { %p873_p13 = pneg %p872_p12 }
  0x24   : > { %p880_p3 = pnand %p879_p2, %p873_p13 }
  0x28   : > { %v869_v15 = vpop.eup %868 }
  0x29   : > { %793 = vmatmul.mubr.msk.f32.vlgmr.msra.gmra.mrb[2].mxu1 %vm369_vm1, %v869_v15 }
  0xf0   : > { %v439_v20 = vpop.f32.mrb[0].mxu1 }
  0xf1   : > { %v527_v21 = vmul.f32 %v439_v20, %v367_v19  ;;  %v789_v22 = vpop.f32.mrb[1].mxu1 }
  0xf3   : > { %812 = vmatmul.mubr.msk.f32.vlgmr.msra.gmra.mrb[0].mxu0 %vm525_vm2, %v527_v21 }
  0xfc   : > { %v512_v24 = vpop.f32.mrb[2].mxu1 }
  0xfd   : > { %v523_v25 = vmul.f32 %v766_v23, %v512_v24  ;;  %v794_v26 = vpop.f32.mrb[3].mxu1 }
  0xff   : > { %v524_v27 = vadd.f32 %v523_v25, %v367_v19 }
 0x101   : > { %526 = vst.msk [vmem:[%s342_s25] sm:$0xff] %vm525_vm2, %v524_v27 }
 0x102   : > { %883 = shalt.err (!%p880_p3)
}
 0x103   : > { %s884_s9 = scalar_lea.hbm %s1090_s18, 128  ;;  %s888_s25 = scalar_lea.hbm %s1144_s8, 256 }
 0x104   : > { %p885_p4 = scmp.ne.s32.totalorder %s1090_s18, %s884_s9  ;;  %p889_p9 = scmp.lt.u32.totalorder %s1090_s18, %s1144_s8 }
 0x105   : > { %p890_p10 = scmp.lt.u32.totalorder %s888_s25, %s884_s9  ;;  %p892_p12 = scmp.lt.u32.totalorder %s884_s9, %s1090_s18 }
 0x106   : > { %p886_p7 = pnand %p885_p4, %p1021_p5 }
 0x107   : > { %p891_p11 = por %p890_p10, %p889_p9 }
 0x108   : > { %p887_p8 = pneg %p886_p7 }
 0x109   : > { %p893_p13 = por %p892_p12, %p891_p11 }
 0x10b   : > { %p894_p0 = pnand %p893_p13, %p887_p8 }
 0x10d   : > { %897 = shalt.err (!%p894_p0)
}
 0x10e   : > { %826 = dma.vmem_to_hbm [thread:$0]  (%p1021_p5), %s636_s10, 128, %s1090_s18, %s619_s19   ;;  %v610_v28 = vmul.f32 %v869_v15, %v1066_v12 }
 0x10f   : > { %s346_s20 = scalar_lea.vmem %s1136_s0, %s1050_s12  ;;  %s362_s9 = scalar_lea.vmem %s1143_s7, %s1050_s12 }
 0x110   : > { %v609_v29 = vld [vmem:[%s346_s20] sm:$0xff] }
 0x111   : > { %v611_v30 = vadd.f32 %v610_v28, %v609_v29 }
 0x1c6   : > { %v605_v31 = vpop.f32.mrb[0].mxu0 }
 0x1c7   : > { %v612_v32 = vadd.f32 %v611_v30, %v605_v31  ;;  %v813_v33 = vpop.f32.mrb[1].mxu0 }
 0x1c9   : > { %613 = vst.msk [vmem:[%s362_s9] sm:$0xff] %vm369_vm1, %v612_v32 }
 0x1ca PF: > { %p832_p5 = scmp.ge.s32.totalorder %s932_s30, 2  ;;  %s654_s15 = sand.u32 1, %s920_s27  }
 0x1cb   : > { %s655_s10 = scalar_lea.sflag [#allocation3], %s654_s15 }
 0x1cc   : > { %p829_p1 = pnand %p832_p5, %p1025_p6 }
 0x1ce   : > { %915 = dma.done.wait (!%p829_p1), %s655_s10, 128  }
 0x1cf   : > { %917 = vsyncadd (!%p829_p1), %s655_s10, 4294967168  ;;  %p19_p2 = scmp.ge.s32.totalorder %s1008_s11, 4   ;;  %s1149_s27 = smov %s924_s28 }
 0x1d0   : > { %s1150_s28 = smov %s928_s29  ;;  %s1151_s29 = smov %s1019_s14 }
 0x1d1   : > { %s1152_s30 = smov %s1008_s11  ;;  %21 = sbr.rel (!%p19_p2) target bundleno = 5 (0x5), region = 104 }
 0x1d8   :  { %660 = vsyncpa [#allocation3], 1 }
 0x1d9   :  { %662 = vsyncpa [#allocation3 + $0x1], 1 }

</bundles_post_ra>
